<compile_context>
chip_gen: v7x
topology: tpu7x:2x2x1
jax: 0.10.0
libtpu: 0.0.40
codegen_flags: <defaults>
</compile_context>

<pallas_src>
import functools

import jax
import jax.numpy as jnp
from jax import lax
from jax.experimental import pallas as pl
from jax.experimental.pallas import tpu as pltpu

LANES = 128
SUBLANES = 8
MAX_BLOCK_ROWS = 8192   # 8192 x 128 f32 = 4 MiB per input per grid step
CHUNK_ROWS = 512        # in-kernel fold chunk: 512 x 128 f32 = 256 KiB


def _round_up(a, b):
    return -(-a // b) * b


def _per_element_loss(x, y, logits):
    if logits:
        # Numerically-stable BCE-with-logits (same formulation PyTorch uses).
        return jnp.maximum(x, 0.0) - x * y + jnp.log1p(jnp.exp(-jnp.abs(x)))
    # nn.BCELoss on probabilities, with PyTorch's log clamp at -100.
    log_p = jnp.maximum(jnp.log(x), -100.0)
    log_1mp = jnp.maximum(jnp.log1p(-x), -100.0)
    return -(y * log_p + (1.0 - y) * log_1mp)


def _fold_chunk(x_ref, y_ref, start, rows, *, logits, masked, n_valid_last):
    """Loss over rows [start, start+rows) of the block, folded to (8, 128)."""
    x = x_ref[pl.ds(start, rows), :].astype(jnp.float32)
    y = y_ref[pl.ds(start, rows), :].astype(jnp.float32)
    per = _per_element_loss(x, y, logits)
    if masked:
        # Mask lane-padding zeros and out-of-bounds rows of a partial
        # trailing block (unspecified VMEM contents).  Keep the where BEFORE
        # the fold so garbage never enters the accumulation.
        row = lax.broadcasted_iota(jnp.int32, per.shape, 0)
        col = lax.broadcasted_iota(jnp.int32, per.shape, 1)
        idx = (start + row) * LANES + col
        per = jnp.where(idx < n_valid_last, per, 0.0)
    # (rows, 128) -> (rows//8, 8, 128) -> sum over leading dim: pure VPU vreg
    # adds, result stays lane-dense (8, 128).
    return per.reshape(rows // SUBLANES, SUBLANES, LANES).sum(axis=0)


def _bce_partial_kernel(x_ref, y_ref, o_ref, *, logits, block_rows,
                        n_valid_last, block_elems):
    """Writes one lane-dense (8, 128) f32 partial sum per grid step."""
    n_full = block_rows // CHUNK_ROWS
    rem = block_rows % CHUNK_ROWS  # multiple of 8 (block_rows, CHUNK_ROWS are)

    def run(masked):
        acc = jnp.zeros((SUBLANES, LANES), jnp.float32)
        if n_full:
            def body(c, a):
                start = pl.multiple_of(c * CHUNK_ROWS, CHUNK_ROWS)
                return a + _fold_chunk(x_ref, y_ref, start, CHUNK_ROWS,
                                       logits=logits, masked=masked,
                                       n_valid_last=n_valid_last)
            acc = lax.fori_loop(0, n_full, body, acc)
        if rem:
            acc = acc + _fold_chunk(x_ref, y_ref, n_full * CHUNK_ROWS, rem,
                                    logits=logits, masked=masked,
                                    n_valid_last=n_valid_last)
        o_ref[0, :, :] = acc

    if n_valid_last == block_elems:
        # Every block fully valid: no masking anywhere (fast path).
        run(masked=False)
    else:
        i = pl.program_id(0)
        last = pl.num_programs(0) - 1

        @pl.when(i < last)
        def _():
            run(masked=False)

        @pl.when(i == last)
        def _():
            run(masked=True)


def bce_loss(y_pr, y_gt, *, logits=True, reduction="mean"):
    """BCE / BCEWithLogits loss over arbitrary-shaped inputs (same shape)."""
    assert y_pr.shape == y_gt.shape
    n_elem = y_pr.size
    assert n_elem > 0

    # Flatten in native dtype (kernel casts to f32 per chunk).
    x = jnp.ravel(y_pr)
    y = jnp.ravel(y_gt)

    # Pad only to the next multiple of 128 lanes (<= 127 elems).  Common NN
    # sizes are already 128-aligned -> no pad, and the reshape below is a
    # free bitcast (no extra HBM traffic).
    padded_len = _round_up(n_elem, LANES)
    pad = padded_len - n_elem
    if pad:
        # TODO(synk): for huge ragged sizes, reduce the <128-elem tail
        # separately to avoid this whole-array pad copy entirely.
        x = jnp.pad(x, (0, pad))
        y = jnp.pad(y, (0, pad))
    rows_total = padded_len // LANES
    x = x.reshape(rows_total, LANES)
    y = y.reshape(rows_total, LANES)

    # Block sizing: large blocks amortize per-step overhead; clamp to half the
    # rows so there are >= 2 grid blocks whenever possible (both v7x
    # TensorCores get work via the "parallel" grid axis).
    half_rows = -(-rows_total // 2)
    block_rows = min(MAX_BLOCK_ROWS, _round_up(max(half_rows, 1), SUBLANES))
    block_elems = block_rows * LANES
    num_blocks = -(-rows_total // block_rows)
    n_valid_last = n_elem - (num_blocks - 1) * block_elems

    kernel = functools.partial(
        _bce_partial_kernel,
        logits=logits,
        block_rows=block_rows,
        n_valid_last=n_valid_last,
        block_elems=block_elems,
    )

    in_spec = pl.BlockSpec((block_rows, LANES), lambda i: (i, 0))
    out_spec = pl.BlockSpec((1, SUBLANES, LANES), lambda i: (i, 0, 0))

    bytes_in = x.size * x.dtype.itemsize + y.size * y.dtype.itemsize
    partials = pl.pallas_call(
        kernel,
        out_shape=jax.ShapeDtypeStruct((num_blocks, SUBLANES, LANES),
                                       jnp.float32),
        grid_spec=pltpu.PrefetchScalarGridSpec(
            num_scalar_prefetch=0,
            grid=(num_blocks,),
            in_specs=[in_spec, in_spec],
            out_specs=out_spec,
        ),
        compiler_params=pltpu.CompilerParams(
            dimension_semantics=("parallel",),
            vmem_limit_bytes=48 * 1024 * 1024,
        ),
        cost_estimate=pl.CostEstimate(
            flops=6 * n_elem,
            transcendentals=2 * n_elem,
            bytes_accessed=bytes_in + num_blocks * SUBLANES * LANES * 4,
        ),
    )(x, y)

    total = jnp.sum(partials, dtype=jnp.float32)
    if reduction == "mean":
        return total / jnp.float32(n_elem)
    elif reduction == "sum":
        return total
    else:
        # TODO(synk): reduction='none' (per-element output) not needed for
        # this module's default config.
        raise NotImplementedError(reduction)


class BCELoss:
    """Mirrors the PyTorch module: logits=True -> BCEWithLogitsLoss."""
    __name__ = "bce_loss"

    def __init__(self, logits=True, reduction="mean"):
        self.logits = logits
        self.reduction = reduction

    def __call__(self, y_pr, y_gt):
        return bce_loss(y_pr, y_gt, logits=self.logits,
                        reduction=self.reduction)


def _ref_loss(y_pr, y_gt, logits=True):
    xf = y_pr.astype(jnp.float32)
    yf = y_gt.astype(jnp.float32)
    if logits:
        per = jnp.maximum(xf, 0.0) - xf * yf + jnp.log1p(jnp.exp(-jnp.abs(xf)))
    else:
        per = -(yf * jnp.maximum(jnp.log(xf), -100.0)
                + (1.0 - yf) * jnp.maximum(jnp.log1p(-xf), -100.0))
    return jnp.mean(per)


if __name__ == "__main__":
    key = jax.random.PRNGKey(0)
    k1, k2, k3, k4 = jax.random.split(key, 4)

    # Default config (logits=True), small NCHW-like segmentation shapes.
    y_pr = jax.random.normal(k1, (2, 4, 16, 16), dtype=jnp.float32)  # logits
    y_gt = (jax.random.uniform(k2, (2, 4, 16, 16)) > 0.5).astype(jnp.float32)

    loss_fn = BCELoss(logits=True, reduction="mean")
    loss = jax.block_until_ready(loss_fn(y_pr, y_gt))
    ref = _ref_loss(y_pr, y_gt, logits=True)
    assert jnp.allclose(loss, ref, rtol=1e-5, atol=1e-6), (loss, ref)

    # Ragged (non-128-multiple) size exercising the masked partial block.
    y_pr2 = jax.random.normal(k3, (3, 5, 7), dtype=jnp.float32)
    y_gt2 = (jax.random.uniform(k4, (3, 5, 7)) > 0.5).astype(jnp.float32)
    loss2 = jax.block_until_ready(bce_loss(y_pr2, y_gt2, logits=True))
    ref2 = _ref_loss(y_pr2, y_gt2, logits=True)
    assert jnp.allclose(loss2, ref2, rtol=1e-5, atol=1e-6), (loss2, ref2)

    # logits=False path (nn.BCELoss on probabilities).
    probs = jax.nn.sigmoid(y_pr)
    loss3 = jax.block_until_ready(bce_loss(probs, y_gt, logits=False))
    ref3 = _ref_loss(probs, y_gt, logits=False)
    assert jnp.allclose(loss3, ref3, rtol=1e-5, atol=1e-6), (loss3, ref3)

    print("KERNEL_OK")
</pallas_src>

<mosaic_0001>
module attributes {stable_mosaic.version = 11 : i64} {
  func.func @_bce_partial_kernel(%arg0: i32, %arg1: memref<8x128xf32, #tpu.memory_space<vmem>>, %arg2: memref<8x128xf32, #tpu.memory_space<vmem>>, %arg3: memref<1x8x128xf32, #tpu.memory_space<vmem>>) attributes {dimension_semantics = [#tpu.dimension_semantics<parallel>], iteration_bounds = array<i64: 2>, scalar_prefetch = 0 : i64, scratch_operands = 0 : i64, tpu.core_type = #tpu.core_type<tc>, window_params = [{transform_indices = @transform_0, window_bounds = array<i64: 8, 128>}, {transform_indices = @transform_1, window_bounds = array<i64: 8, 128>}, {transform_indices = @transform_2, window_bounds = array<i64: 1, 8, 128>}]} {
    %cst = arith.constant 0.000000e+00 : f32
    %0 = vector.broadcast %cst : f32 to vector<8x128xf32>
    %c0 = arith.constant 0 : index
    %c0_0 = arith.constant 0 : index
    %1 = vector.load %arg1[%c0, %c0_0] : memref<8x128xf32, #tpu.memory_space<vmem>>, vector<8x128xf32>
    %c0_1 = arith.constant 0 : index
    %c0_2 = arith.constant 0 : index
    %2 = vector.load %arg2[%c0_1, %c0_2] : memref<8x128xf32, #tpu.memory_space<vmem>>, vector<8x128xf32>
    %cst_3 = arith.constant 0.000000e+00 : f32
    %3 = vector.broadcast %cst_3 : f32 to vector<8x128xf32>
    %4 = arith.maximumf %1, %3 : vector<8x128xf32>
    %5 = arith.mulf %1, %2 : vector<8x128xf32>
    %6 = arith.subf %4, %5 : vector<8x128xf32>
    %7 = math.absf %1 : vector<8x128xf32>
    %cst_4 = arith.constant 0.000000e+00 : f32
    %8 = vector.broadcast %cst_4 : f32 to vector<8x128xf32>
    %9 = arith.subf %8, %7 : vector<8x128xf32>
    %10 = math.exp %9 : vector<8x128xf32>
    %11 = math.log1p %10 : vector<8x128xf32>
    %12 = arith.addf %6, %11 : vector<8x128xf32>
    %13 = vector.shape_cast %12 : vector<8x128xf32> to vector<1x8x128xf32>
    %cst_5 = arith.constant dense<0.000000e+00> : vector<8x128xf32>
    %14 = vector.multi_reduction <add>, %13, %cst_5 [0] : vector<1x8x128xf32> to vector<8x128xf32>
    %15 = arith.addf %0, %14 : vector<8x128xf32>
    %c0_6 = arith.constant 0 : index
    %c0_7 = arith.constant 0 : index
    %c0_8 = arith.constant 0 : index
    %16 = vector.load %arg3[%c0_6, %c0_7, %c0_8] : memref<1x8x128xf32, #tpu.memory_space<vmem>>, vector<1x8x128xf32>
    %17 = vector.shape_cast %16 : vector<1x8x128xf32> to vector<8x128xf32>
    %18 = vector.shape_cast %15 : vector<8x128xf32> to vector<1x8x128xf32>
    tpu.vector_store %arg3[%c0_6, %c0_7, %c0_8], %18 {strides = array<i32>} : memref<1x8x128xf32, #tpu.memory_space<vmem>>, vector<1x8x128xf32>,
    return
  }
  func.func @transform_0(%arg0: i32) -> (i32, i32) {
    %c0_i32 = arith.constant 0 : i32
    %c0_i32_0 = arith.constant 0 : i32
    return %arg0, %c0_i32 : i32, i32
  }
  func.func @transform_1(%arg0: i32) -> (i32, i32) {
    %c0_i32 = arith.constant 0 : i32
    %c0_i32_0 = arith.constant 0 : i32
    return %arg0, %c0_i32 : i32, i32
  }
  func.func @transform_2(%arg0: i32) -> (i32, i32, i32) {
    %c0_i32 = arith.constant 0 : i32
    %c0_i32_0 = arith.constant 0 : i32
    %c0_i32_1 = arith.constant 0 : i32
    return %arg0, %c0_i32, %c0_i32_0 : i32, i32, i32
  }
}

</mosaic_0001>

<bundles_post_ra>
// kernel: tpu_custom_call.1
= control target key start
LH: loop header
LB: loop body
LE: loop exit
PB: predicated region body
PF: predicated region fallthrough
CT: control target
= control target key end

     0   :  { %7 = vsyncpa [#allocation3], 0  ;;  %s759_s0 = inlined_call_operand.hbm [shape: f32[16,128], index: 0, kind: input, shape index: {}]   ;;  %s760_s1 = inlined_call_operand.hbm [shape: f32[16,128], index: 1, kind: input, shape index: {}]   ;;  %s761_s2 = inlined_call_operand.hbm [shape: f32[2,8,128], index: 2, kind: output, shape index: {}]  }
   0x1   :  { %9 = vsyncpa [#allocation3 + $0x1], 0 }
   0x2   :  { %10 = vsyncpa [#allocation6], 0 }
   0x3   :  { %12 = vsyncpa [#allocation6 + $0x1], 0 }
   0x4   :  { %13 = vsyncpa [#allocation4], 0 }
   0x5   :  { %15 = vsyncpa [#allocation4 + $0x1], 0  ;;  %s545_s9 = smov 0   ;;  %s547_s10 = smov 0  }
   0x6   :  { %s549_s11 = smov 0   ;;  %s551_s12 = smov 0  }
   0x7 LB: > { %s566_s13 = sadd.s32 4294967295, %s525_s12   ;;  %s325_s14 = sadd.s32 4294967294, %s525_s12   ;;  %s525_s12 = sphi %s551_s12, %s780_s12   ;;  %s521_s11 = sphi %s549_s11, %s779_s11   ;;  %s517_s10 = sphi %s547_s10, %s778_s10   ;;  %s513_s9 = sphi %s545_s9, %s777_s9  }
   0x8   : > { %s570_s15 = sadd.s32 1, %s525_s12   ;;  %s28_s16 = sadd.s32 1, %s521_s11 }
   0x9   : > { %s25_s17 = ssub.s32 %s525_s12, %s570_s15  ;;  %p35_p0 = scmp.ne.s32.totalorder %s521_s11, %s517_s10 }
   0xa   : > { %p26_p1 = scmp.eq.s32.totalorder %s25_s17, 0  ;;  %p36_p2 = scmp.eq.s32.totalorder %s525_s12, 0 }
   0xb   : > { %p41_p3 = scmp.ne.s32.totalorder %s517_s10, %s513_s9  ;;  %p42_p4 = scmp.eq.s32.totalorder %s566_s13, 0 }
   0xc   : > { %s582_s18 = scalar_select %p26_p1, %s521_s11, %s28_s16  }
   0xd   : > { %p584_p5 = por %p36_p2, %p35_p0  ;;  %p588_p6 = por %p42_p4, %p41_p3 }
   0xe   : > { %p91_p7 = scmp.eq.s32.totalorder %s566_s13, 1  ;;  %p97_p8 = scmp.eq.s32.totalorder %s325_s14, 1 }
   0xf   : > { %s765_s20 = scalar_select %p588_p6, 1, 0 }
  0x10   : > { %p357_p10 = scmp.lt.s32.totalorder %s525_s12, 2  ;;  %p595_p11 = por %p91_p7, %p35_p0 }
  0x11   : > { %p599_p12 = por %p97_p8, %p41_p3  ;;  %s604_s23 = sand.u32 1, %s521_s11  }
  0x12   : > { %s766_s21 = scalar_select %p595_p11, 1, 0 }
  0x13   : > { %s767_s22 = scalar_select %p599_p12, 1, 0 }
  0x14   : > { %s329_s24 = sshll.u32 %s525_s12, 7  ;;  %s328_s25 = sshll.u32 %s604_s23, 3 }
  0x15   : > { %s613_s28 = scalar_lea.hbm %s759_s0, %s329_s24  ;;  %s121_s29 = scalar_lea.vmem [#allocation2], %s328_s25 }
  0x16   : > { %s128_s30 = sshll.u32 %s121_s29, 4  ;;  %p619_p13 = pnand %p357_p10, %p584_p5  ;;  %s623_s30 = int_to_ptr.vmem [resolvable:$true] %s128_s30 }
  0x17   : > { %s118_s4 = scalar_lea.sflag [#allocation3], %s604_s23  ;;  %s395_s5 = scalar_lea.hbm %s613_s28, 128 }
  0x18   : > { %p396_p2 = scmp.ne.s32.totalorder %s613_s28, %s395_s5  ;;  %p397_p3 = pneg %p619_p13 }
  0x19   : > { %s400_s8 = scalar_lea.hbm %s759_s0, 256  ;;  %p401_p5 = scmp.lt.u32.totalorder %s613_s28, %s759_s0 }
  0x1a   : > { %p398_p4 = pnand %p397_p3, %p396_p2  ;;  %p402_p8 = scmp.lt.u32.totalorder %s400_s8, %s395_s5 }
  0x1b   : > { %p404_p9 = scmp.lt.u32.totalorder %s395_s5, %s613_s28 }
  0x1c   : > { %p399_p7 = pneg %p398_p4  ;;  %p403_p10 = por %p402_p8, %p401_p5 }
  0x1e   : > { %p405_p0 = por %p404_p9, %p403_p10 }
  0x20   : > { %p406_p1 = pnand %p405_p0, %p399_p7 }
  0x22   : > { %409 = shalt.err (!%p406_p1)
}
  0x23   : > { %s410_s17 = scalar_lea.vmem %s623_s30, 128  ;;  %s527_s19 = smov [#allocation2]  }
  0x24   : > { %p411_p2 = scmp.ne.s32.totalorder %s623_s30, %s410_s17  ;;  %s415_s26 = sshll.u32 %s527_s19, 4  ;;  %s416_s26 = int_to_ptr.vmem [resolvable:$false] %s415_s26 }
  0x25   : > { %s417_s27 = scalar_lea.vmem %s416_s26, 256  ;;  %p418_p11 = scmp.lt.s32.totalorder %s623_s30, %s416_s26 }
  0x26   : > { %p413_p4 = pnand %p411_p2, %p397_p3  ;;  %p419_p5 = scmp.lt.s32.totalorder %s417_s27, %s410_s17 }
  0x28   : > { %p414_p12 = pneg %p413_p4  ;;  %p420_p8 = por %p419_p5, %p418_p11 }
  0x2a   : > { %p421_p9 = pnand %p420_p8, %p414_p12 }
  0x2c   : > { %424 = shalt.err (!%p421_p9)
}
  0x2d   : > { %349 = dma.hbm_to_vmem [thread:$0]  (!%p619_p13), %s613_s28, 128, %s623_s30, %s118_s4  }
  0x2e   : > { %p769_p0 = scmp.lt.s32.totalorder %s525_s12, 3  ;;  %p770_p1 = scmp.ge.s32.totalorder %s525_s12, 1 }
  0x2f   : > { %s666_s7 = scalar_lea.hbm %s760_s1, %s329_s24  ;;  %s139_s8 = scalar_lea.vmem [#allocation5], %s328_s25 }
  0x30   : > { %p657_p7 = pnand %p770_p1, %p769_p0  ;;  %s146_s14 = sshll.u32 %s139_s8, 4  ;;  %s147_s14 = int_to_ptr.vmem [resolvable:$true] %s146_s14 }
  0x31   : > { %s136_s28 = scalar_lea.sflag [#allocation6], %s604_s23  ;;  %s425_s30 = scalar_lea.hbm %s666_s7, 128 }
  0x32   : > { %s771_s29 = scalar_select %p657_p7, 1, 0 }
  0x33   : > { %p426_p11 = scmp.ne.s32.totalorder %s666_s7, %s425_s30  ;;  %s430_s24 = scalar_lea.hbm %s760_s1, 256 }
  0x34   : > { %p431_p2 = scmp.lt.u32.totalorder %s666_s7, %s760_s1  ;;  %p432_p4 = scmp.lt.u32.totalorder %s430_s24, %s425_s30 }
  0x35   : > { %p428_p12 = pnand %p426_p11, %p397_p3  ;;  %p434_p8 = scmp.lt.u32.totalorder %s425_s30, %s666_s7 }
  0x36   : > { %p433_p5 = por %p432_p4, %p431_p2 }
  0x37   : > { %p429_p10 = pneg %p428_p12 }
  0x38   : > { %p435_p9 = por %p434_p8, %p433_p5 }
  0x3a   : > { %p436_p0 = pnand %p435_p9, %p429_p10 }
  0x3c   : > { %439 = shalt.err (!%p436_p0)
}
  0x3d   : > { %s440_s23 = scalar_lea.vmem %s147_s14, 128  ;;  %s528_s25 = smov [#allocation5]  }
  0x3e   : > { %p441_p1 = scmp.ne.s32.totalorder %s147_s14, %s440_s23  ;;  %s445_s26 = sshll.u32 %s528_s25, 4  ;;  %s446_s26 = int_to_ptr.vmem [resolvable:$false] %s445_s26 }
  0x3f   : > { %s447_s27 = scalar_lea.vmem %s446_s26, 256  ;;  %p448_p6 = scmp.lt.s32.totalorder %s147_s14, %s446_s26 }
  0x40   : > { %p443_p11 = pnand %p441_p1, %p397_p3  ;;  %p449_p7 = scmp.lt.s32.totalorder %s447_s27, %s440_s23 }
  0x42   : > { %p444_p12 = pneg %p443_p11  ;;  %p450_p2 = por %p449_p7, %p448_p6 }
  0x44   : > { %p451_p4 = pnand %p450_p2, %p444_p12 }
  0x46   : > { %454 = shalt.err (!%p451_p4)
}
  0x47   : > { %352 = dma.hbm_to_vmem [thread:$0]  (!%p619_p13), %s666_s7, 128, %s147_s14, %s136_s28  }
  0x48   : > { %p772_p10 = scmp.ne.s32.totalorder %s771_s29, 0 }
  0x49   : > { %s693_s5 = sand.u32 (!%p772_p10), 1, %s517_s10   ;;  %p773_p6 = scmp.ne.s32.totalorder (!%p772_p10), %s765_s20, 0 }
  0x4a   : > { %155 = sbr.rel (%p772_p10) target bundleno = 134 (0x86), region = 28  ;;  %s696_s6 = sshll.u32 (!%p772_p10), %s693_s5, 3 }
  0x4b   : > { %s158_s8 = scalar_lea.sflag (!%p772_p10), [#allocation3], %s693_s5  ;;  %s161_s30 = scalar_lea.vmem (!%p772_p10), [#allocation2], %s696_s6 }
  0x51   : > { %500 = dma.done.wait (%p773_p6), %s158_s8, 128  }
  0x52   : > { %502 = vsyncadd (%p773_p6), %s158_s8, 4294967168  ;;  %s167_s3 = scalar_lea.sflag [#allocation6], %s693_s5  ;;  %s170_s29 = scalar_lea.vmem [#allocation5], %s696_s6 }
  0x53   : > { %504 = dma.done.wait (%p773_p6), %s167_s3, 128  }
  0x54   : > { %506 = vsyncadd (%p773_p6), %s167_s3, 4294967168  ;;  %v196_v0 = vld [vmem:[%s161_s30] sm:$0xff]  ;;  %v197_v7 = vld [vmem:[%s170_s29] sm:$0xff]  ;;  %s195_s20 = scalar_lea.vmem [#allocation7], %s696_s6  ;;  %s337_s14 = sshll.u32 %s566_s13, 7 }
  0x55   : > { %v201_v1 = vand.u32 2147483647, %v196_v0  ;;  %v198_v9 = vmax.f32 %v196_v0, 0.0  ;;  %v199_v10 = vmul.f32 %v197_v7, %v196_v0  ;;  %s232_s7 = sshll.u32 %s195_s20, 4  ;;  %s717_s16 = scalar_lea.hbm %s761_s2, %s337_s14  ;;  %s712_s7 = int_to_ptr.vmem [resolvable:$true] %s232_s7 }
  0x56   : > { %s219_s24 = scalar_lea.sflag [#allocation4], %s693_s5  ;;  %s455_s17 = scalar_lea.vmem %s712_s7, 128 }
  0x57   : > { %v202_v2 = vsub.f32 0.0, %v201_v1  ;;  %v200_v14 = vsub.f32 %v198_v9, %v199_v10  ;;  %p456_p13 = scmp.ne.s32.totalorder %s712_s7, %s455_s17  ;;  %p774_p3 = scmp.ne.s32.totalorder %s766_s21, 0 }
  0x58   : > { %s529_s13 = smov [#allocation7]  }
  0x59   : > { %v203_v3 = vmul.f32 1.442695, %v202_v2  ;;  %p457_p7 = pnand %p456_p13, %p774_p3  ;;  %s459_s19 = sshll.u32 %s529_s13, 4  ;;  %s460_s19 = int_to_ptr.vmem [resolvable:$false] %s459_s19 }
  0x5a   : > { %s461_s23 = scalar_lea.vmem %s460_s19, 256  ;;  %p462_p8 = scmp.lt.s32.totalorder %s712_s7, %s460_s19 }
  0x5b   : > { %391 = vpow2.f32 %v203_v3  ;;  %p458_p5 = pneg %p457_p7  ;;  %p463_p9 = scmp.lt.s32.totalorder %s461_s23, %s455_s17 }
  0x5d   : > { %p464_p0 = por %p463_p9, %p462_p8 }
  0x5f   : > { %p465_p1 = pnand %p464_p0, %p458_p5 }
  0x65   : > { %v392_v4 = vpop.eup %391 }
  0x66   : > { %v205_v5 = vadd.f32 1.0, %v392_v4  ;;  %v208_v6 = vmul.f32 -0.5, %v392_v4  ;;  %v211_v11 = vand.u32 2147483647, %v392_v4 }
  0x68   : > { %393 = vlog2.f32 %v205_v5  ;;  %v209_v8 = vadd.f32 1.0, %v208_v6  ;;  %vm212_vm0 = vcmp.lt.f32.partialorder %v211_v11, 0.0004427343 }
  0x6a   : > { %v210_v12 = vmul.f32 %v392_v4, %v209_v8 }
  0x72   : > { %v394_v13 = vpop.eup %393 }
  0x73   : > { %v207_v15 = vmul.f32 0.6931472, %v394_v13 }
  0x75   : > { %v213_v16 = vsel %vm212_vm0, %v210_v12, %v207_v15 }
  0x76   : > { %v214_v17 = vadd.f32 %v213_v16, %v200_v14 }
  0x78   : > { %217 = vst [vmem:[%s195_s20] sm:$0xff] %v214_v17 }
  0x79   : > { %468 = shalt.err (!%p465_p1)
}
  0x7a   : > { %s469_s25 = scalar_lea.hbm %s717_s16, 128  ;;  %s473_s5 = scalar_lea.hbm %s761_s2, 256 }
  0x7b   : > { %p470_p11 = scmp.ne.s32.totalorder %s717_s16, %s469_s25  ;;  %p474_p4 = scmp.lt.u32.totalorder %s717_s16, %s761_s2 }
  0x7c   : > { %p475_p10 = scmp.lt.u32.totalorder %s473_s5, %s469_s25  ;;  %p477_p13 = scmp.lt.u32.totalorder %s469_s25, %s717_s16 }
  0x7d   : > { %p471_p12 = pnand %p470_p11, %p774_p3 }
  0x7e   : > { %p476_p6 = por %p475_p10, %p474_p4 }
  0x7f   : > { %p472_p2 = pneg %p471_p12 }
  0x80   : > { %p478_p7 = por %p477_p13, %p476_p6 }
  0x82   : > { %p479_p5 = pnand %p478_p7, %p472_p2 }
  0x84   : > { %482 = shalt.err (!%p479_p5)
}
  0x85   : > { %344 = dma.vmem_to_hbm [thread:$0]  (%p774_p3), %s712_s7, 128, %s717_s16, %s219_s24  }
  0x86 PF: > { %s244_s30 = sand.u32 1, %s513_s9   ;;  %p775_p8 = scmp.ne.s32.totalorder %s767_s22, 0 }
  0x87   : > { %p776_p9 = scmp.ge.s32.totalorder %s525_s12, 2  ;;  %s245_s3 = scalar_lea.sflag [#allocation4], %s244_s30 }
  0x89   : > { %p354_p0 = pnand %p776_p9, %p775_p8 }
  0x8b   : > { %508 = dma.done.wait (!%p354_p0), %s245_s3, 128  }
  0x8c   : > { %510 = vsyncadd (!%p354_p0), %s245_s3, 4294967168  ;;  %p18_p1 = scmp.ge.s32.totalorder %s570_s15, 4   ;;  %s777_s9 = smov %s517_s10 }
  0x8d   : > { %s778_s10 = smov %s521_s11  ;;  %s779_s11 = smov %s582_s18 }
  0x8e   : > { %s780_s12 = smov %s570_s15  ;;  %20 = sbr.rel (!%p18_p1) target bundleno = 7 (0x7), region = 86 }
  0x95   :  { %250 = vsyncpa [#allocation3], 1 }
  0x96   :  { %252 = vsyncpa [#allocation3 + $0x1], 1 }
  0x97   :  { %253 = vsyncpa [#allocation6], 1 }
  0x98   :  { %255 = vsyncpa [#allocation6 + $0x1], 1 }
  0x99   :  { %256 = vsyncpa [#allocation4], 1 }
  0x9a   :  { %258 = vsyncpa [#allocation4 + $0x1], 1 }

</bundles_post_ra>
